<compile_context>
chip_gen: v7x
topology: tpu7x:2x2x1
jax: 0.10.0
libtpu: 0.0.40
codegen_flags: <defaults>
</compile_context>

<pallas_src>
import functools

import jax
import jax.numpy as jnp
from jax.experimental import pallas as pl
from jax.experimental.pallas import tpu as pltpu


def _round_up(v, m):
    return (v + m - 1) // m * m


def _std_linear_kernel(x_ref, rhs_ref, a2_ref, bias_ref, *out_refs,
                       lin_out, std, lin_out_p, std_p, inv_n, inv_nm1,
                       fused_out):
    # Native-dtype LHS/RHS -> full-rate MXU path for the dominant matmul.
    x = x_ref[...]

    # One fused MXU pass over [W | sw.T | (2*sb*sw^2).T]; f32 accumulation;
    # single fused bias row [b | c1 | c2] added once.
    y = jnp.dot(x, rhs_ref[...], preferred_element_type=jnp.float32)
    y = y + bias_ref[...]

    lin = y[:, :lin_out]                                  # x @ W + b
    s1 = y[:, lin_out_p:lin_out_p + std_p]                # sum_i si      (+ pad cols = 0)
    t2 = y[:, lin_out_p + std_p:]                         # x @ (2*sb*sw^2).T + c2

    # Small second matmul: sum_i x^2 * sw^2.  Kept strictly in f32 for the
    # cancellation-prone variance combine.
    xf = x.astype(jnp.float32)
    s2 = jnp.dot(xf * xf, a2_ref[...], preferred_element_type=jnp.float32) + t2

    var = (s2 - s1 * s1 * inv_n) * inv_nm1                # unbiased (ddof=1)
    var = jnp.maximum(var, 0.0)                           # guard cancellation
    stdv = jnp.sqrt(var)

    if fused_out:
        # LIN_OUT is a multiple of 128: both stores start on lane boundaries.
        out_ref, = out_refs
        out_ref[:, :lin_out] = lin.astype(out_ref.dtype)
        out_ref[:, lin_out:] = stdv[:, :std].astype(out_ref.dtype)
    else:
        # Two lane-aligned output slabs; concatenated once in the wrapper.
        lin_ref, std_ref = out_refs
        lin_ref[...] = lin.astype(lin_ref.dtype)
        std_ref[...] = stdv[:, :std].astype(std_ref.dtype)


def std_linear_forward(x, w, b, std_w, std_b, *, b_tile=None,
                       vmem_limit_bytes=None, single_buffer_weights=False):
    """StdLinear forward.

    x: (B, IN); w: (IN, LIN_OUT) [linear weight stored transposed];
    b: (LIN_OUT,); std_w / std_b: (STD, IN).
    Returns concat([x @ w + b, std((x + std_b) * std_w, axis=-1, ddof=1)], -1).

    Tuning knobs:
      b_tile                : batch tile (multiple of 8). Default targets
                              <=256 rows and >= ~8 grid steps (v7x-friendly);
                              v6e with 128 MiB VMEM can pass 512.
      vmem_limit_bytes      : scoped VMEM limit; auto-computed when None.
      single_buffer_weights : mark the constant-index weight specs
                              pl.Buffered(1) (halves resident-weight VMEM on
                              v7x, 64 MiB/TC).
    """
    B, IN = x.shape
    LIN_OUT = w.shape[1]
    STD = std_w.shape[0]
    OUT = LIN_OUT + STD
    assert IN > 1, "unbiased std needs IN > 1"
    assert STD >= 1

    out_dtype = x.dtype
    itemsize = jnp.dtype(out_dtype).itemsize

    # ---- batch tiling (arbitrary B; no divisibility assert) ----------------
    if b_tile is None:
        bp8 = _round_up(B, 8)
        cap = min(256, max(8, (B // 8) // 8 * 8))      # aim for >= ~8 steps
        b_tile = 8
        for d in range(cap, 7, -8):
            if bp8 % d == 0:
                b_tile = d
                break
    assert b_tile % 8 == 0, b_tile
    B_pad = _round_up(B, b_tile)
    if B_pad != B:
        x = jnp.pad(x, ((0, B_pad - B), (0, 0)))
    grid = (B_pad // b_tile,)

    # ---- weight-only precomputes (done once, outside the kernel) -----------
    # si[b,k,i] = (x[b,i] + sb[k,i]) * sw[k,i]
    #   sum_i si    = x @ sw.T + c1
    #   sum_i si^2  = (x*x) @ (sw^2).T + x @ (2*sb*sw^2).T + c2
    # All x-LHS matmuls share one RHS slab; each segment is padded to a
    # 128-lane boundary so in-kernel slices stay lane-aligned and the MXU N
    # dim is a multiple of 128 (v5e: no ragged trailing pass).
    sw = std_w.astype(jnp.float32)
    sb = std_b.astype(jnp.float32)
    LIN_OUT_P = _round_up(LIN_OUT, 128)
    STD_P = _round_up(STD, 128)
    N_TOTAL = LIN_OUT_P + 2 * STD_P

    rhs = jnp.zeros((IN, N_TOTAL), jnp.float32)
    rhs = rhs.at[:, :LIN_OUT].set(w.astype(jnp.float32))
    rhs = rhs.at[:, LIN_OUT_P:LIN_OUT_P + STD].set(sw.T)
    rhs = rhs.at[:, LIN_OUT_P + STD_P:LIN_OUT_P + STD_P + STD].set(
        (2.0 * sb * sw * sw).T)
    rhs = rhs.astype(x.dtype)          # native-dtype MXU inputs (bf16 stays bf16)

    bias_row = jnp.zeros((1, N_TOTAL), jnp.float32)
    bias_row = bias_row.at[:, :LIN_OUT].set(b.astype(jnp.float32))
    bias_row = bias_row.at[:, LIN_OUT_P:LIN_OUT_P + STD].set(
        jnp.sum(sb * sw, axis=-1))
    bias_row = bias_row.at[:, LIN_OUT_P + STD_P:LIN_OUT_P + STD_P + STD].set(
        jnp.sum((sb * sw) ** 2, axis=-1))

    a2 = jnp.zeros((IN, STD_P), jnp.float32)
    a2 = a2.at[:, :STD].set((sw * sw).T)   # stays f32 for the std branch

    # ---- output layout ------------------------------------------------------
    fused_out = (LIN_OUT % 128 == 0)

    kernel = functools.partial(
        _std_linear_kernel,
        lin_out=LIN_OUT, std=STD, lin_out_p=LIN_OUT_P, std_p=STD_P,
        inv_n=1.0 / IN, inv_nm1=1.0 / (IN - 1), fused_out=fused_out)

    def _w_spec(shape):
        if single_buffer_weights:
            return pl.BlockSpec(shape, lambda i: (0, 0),
                                pipeline_mode=pl.Buffered(1))
        return pl.BlockSpec(shape, lambda i: (0, 0))

    in_specs = [
        pl.BlockSpec((b_tile, IN), lambda i: (i, 0)),   # x tile (pipelined)
        _w_spec((IN, N_TOTAL)),                          # fused RHS (resident)
        _w_spec((IN, STD_P)),                            # a2 (resident, f32)
        _w_spec((1, N_TOTAL)),                           # fused bias row
    ]

    if fused_out:
        out_shape = jax.ShapeDtypeStruct((B_pad, OUT), out_dtype)
        out_specs = pl.BlockSpec((b_tile, OUT), lambda i: (i, 0))
        out_width = OUT
    else:
        out_shape = (jax.ShapeDtypeStruct((B_pad, LIN_OUT), out_dtype),
                     jax.ShapeDtypeStruct((B_pad, STD), out_dtype))
        out_specs = (pl.BlockSpec((b_tile, LIN_OUT), lambda i: (i, 0)),
                     pl.BlockSpec((b_tile, STD), lambda i: (i, 0)))
        out_width = LIN_OUT + STD

    # ---- VMEM limit from the real footprint --------------------------------
    if vmem_limit_bytes is None:
        f32 = 4
        buf = 1 if single_buffer_weights else 2
        wbytes = buf * (IN * N_TOTAL * itemsize
                        + IN * STD_P * f32 + 8 * N_TOTAL * f32)
        iobytes = 2 * b_tile * (IN + out_width) * itemsize   # double-buffered
        scratch = b_tile * (2 * N_TOTAL + 4 * STD_P + 2 * IN) * f32
        need = int((wbytes + iobytes + scratch) * 1.25) + (1 << 20)
        if need > 32 * 1024 * 1024:
            # Above default scoped limit (v5e/v6e: 128 MiB physical). On v7x
            # (64 MiB/TC) pass b_tile / single_buffer_weights / an explicit
            # limit for very large weights.
            vmem_limit_bytes = min(need, 100 * 1024 * 1024)

    cp_kwargs = dict(dimension_semantics=("parallel",))
    if vmem_limit_bytes is not None:
        cp_kwargs["vmem_limit_bytes"] = int(vmem_limit_bytes)

    result = pl.pallas_call(
        kernel,
        out_shape=out_shape,
        grid_spec=pltpu.PrefetchScalarGridSpec(
            num_scalar_prefetch=0,
            grid=grid,
            in_specs=in_specs,
            out_specs=out_specs,
        ),
        compiler_params=pltpu.CompilerParams(**cp_kwargs),
    )(x, rhs, a2, bias_row)

    if fused_out:
        out = result
    else:
        lin_o, std_o = result
        out = jnp.concatenate([lin_o, std_o], axis=-1)
    if B_pad != B:
        out = out[:B]
    # TODO(synk): for very large LIN_OUT on v7x, add a second "parallel" grid
    # axis over 128k-wide N tiles of the fused RHS (std segments pinned to the
    # final tile) so only an (IN, tn) weight slice is resident per step.
    return out


def init_params(key, in_features, out_features, std_frac=1.0 / 8.0):
    """Synthetic init matching StdLinear.__init__ shapes/semantics."""
    std_features = int(out_features * std_frac)
    lin_out = out_features - std_features

    k_w, k_b, k_m = jax.random.split(key, 3)
    bound = 1.0 / jnp.sqrt(jnp.float32(in_features))
    # nn.Linear.reset_parameters-style uniform init (stored transposed: (IN, LIN_OUT)).
    w = jax.random.uniform(k_w, (in_features, lin_out), jnp.float32, -bound, bound)
    b = jax.random.uniform(k_b, (lin_out,), jnp.float32, -bound, bound)

    # std_weight: binomial(1, 0.3) mask, all-zero rows set to 1, row-normalized by mean.
    mask = jax.random.bernoulli(k_m, 0.3, (std_features, in_features)).astype(jnp.float32)
    row_sum = mask.sum(-1, keepdims=True)
    mask = jnp.where(row_sum == 0, jnp.ones_like(mask), mask)
    std_w = mask / mask.mean(-1, keepdims=True)

    std_b = jnp.zeros((std_features, in_features), jnp.float32)
    return w, b, std_w, std_b


def reference_forward(x, w, b, std_w, std_b):
    lin = x @ w + b
    si = (x[:, None, :] + std_b[None, :, :]) * std_w[None, :, :]
    std = jnp.std(si, axis=-1, ddof=1)
    return jnp.concatenate([lin, std], axis=-1)


if __name__ == "__main__":
    IN_FEATURES = 32
    OUT_FEATURES = 32   # -> std_features = 4, lin_out = 28
    BATCH = 8

    key = jax.random.PRNGKey(0)
    k_x, k_p, k_sb = jax.random.split(key, 3)
    x = jax.random.normal(k_x, (BATCH, IN_FEATURES), jnp.float32)
    w, b, std_w, std_b = init_params(k_p, IN_FEATURES, OUT_FEATURES)
    # Perturb std_bias away from its zero init so the bias path is exercised.
    std_b = 0.1 * jax.random.normal(k_sb, std_b.shape, jnp.float32)

    out = std_linear_forward(x, w, b, std_w, std_b)
    out = jax.block_until_ready(out)

    ref = reference_forward(x, w, b, std_w, std_b)
    assert out.shape == (BATCH, OUT_FEATURES), out.shape
    assert jnp.allclose(out, ref, atol=1e-4, rtol=1e-4), float(jnp.max(jnp.abs(out - ref)))

    print("KERNEL_OK")
</pallas_src>

<mosaic_0001>
module attributes {stable_mosaic.version = 11 : i64} {
  func.func @_std_linear_kernel(%arg0: i32, %arg1: memref<8x32xf32, #tpu.memory_space<vmem>>, %arg2: memref<32x384xf32, #tpu.memory_space<vmem>>, %arg3: memref<32x128xf32, #tpu.memory_space<vmem>>, %arg4: memref<1x384xf32, #tpu.memory_space<vmem>>, %arg5: memref<8x28xf32, #tpu.memory_space<vmem>>, %arg6: memref<8x4xf32, #tpu.memory_space<vmem>>) attributes {dimension_semantics = [#tpu.dimension_semantics<parallel>], iteration_bounds = array<i64: 1>, scalar_prefetch = 0 : i64, scratch_operands = 0 : i64, tpu.core_type = #tpu.core_type<tc>, window_params = [{transform_indices = @transform_0, window_bounds = array<i64: 8, 32>}, {pipeline_mode = #tpu.pipeline_mode<synchronous>, transform_indices = @transform_1, window_bounds = array<i64: 32, 384>}, {pipeline_mode = #tpu.pipeline_mode<synchronous>, transform_indices = @transform_2, window_bounds = array<i64: 32, 128>}, {pipeline_mode = #tpu.pipeline_mode<synchronous>, transform_indices = @transform_3, window_bounds = array<i64: 1, 384>}, {transform_indices = @transform_4, window_bounds = array<i64: 8, 28>}, {transform_indices = @transform_5, window_bounds = array<i64: 8, 4>}]} {
    %c0 = arith.constant 0 : index
    %c0_0 = arith.constant 0 : index
    %0 = vector.load %arg1[%c0, %c0_0] : memref<8x32xf32, #tpu.memory_space<vmem>>, vector<8x32xf32>
    %c0_1 = arith.constant 0 : index
    %c0_2 = arith.constant 0 : index
    %1 = vector.load %arg2[%c0_1, %c0_2] : memref<32x384xf32, #tpu.memory_space<vmem>>, vector<32x384xf32>
    %cst = arith.constant dense<0.000000e+00> : vector<8x384xf32>
    %2 = tpu.matmul %0, %1, %cst {dimension_numbers = #tpu.dot_dimension_numbers<[1], [0], [0], [1], [0, 0, 1, 1], [], []>} : vector<8x32xf32>, vector<32x384xf32>, vector<8x384xf32> -> vector<8x384xf32>
    %c0_3 = arith.constant 0 : index
    %c0_4 = arith.constant 0 : index
    %3 = vector.load %arg4[%c0_3, %c0_4] : memref<1x384xf32, #tpu.memory_space<vmem>>, vector<1x384xf32>
    %4 = vector.broadcast %3 : vector<1x384xf32> to vector<8x384xf32>
    %5 = arith.addf %2, %4 : vector<8x384xf32>
    %6 = vector.extract_strided_slice %5 {offsets = [0, 0], sizes = [8, 28], strides = [1, 1]} : vector<8x384xf32> to vector<8x28xf32>
    %7 = vector.extract_strided_slice %5 {offsets = [0, 128], sizes = [8, 128], strides = [1, 1]} : vector<8x384xf32> to vector<8x128xf32>
    %8 = vector.extract_strided_slice %5 {offsets = [0, 256], sizes = [8, 128], strides = [1, 1]} : vector<8x384xf32> to vector<8x128xf32>
    %9 = arith.mulf %0, %0 : vector<8x32xf32>
    %c0_5 = arith.constant 0 : index
    %c0_6 = arith.constant 0 : index
    %10 = vector.load %arg3[%c0_5, %c0_6] : memref<32x128xf32, #tpu.memory_space<vmem>>, vector<32x128xf32>
    %cst_7 = arith.constant dense<0.000000e+00> : vector<8x128xf32>
    %11 = tpu.matmul %9, %10, %cst_7 {dimension_numbers = #tpu.dot_dimension_numbers<[1], [0], [0], [1], [0, 0, 1, 1], [], []>} : vector<8x32xf32>, vector<32x128xf32>, vector<8x128xf32> -> vector<8x128xf32>
    %12 = arith.addf %11, %8 : vector<8x128xf32>
    %13 = arith.mulf %7, %7 : vector<8x128xf32>
    %cst_8 = arith.constant 3.125000e-02 : f32
    %14 = vector.broadcast %cst_8 : f32 to vector<8x128xf32>
    %15 = arith.mulf %13, %14 : vector<8x128xf32>
    %16 = arith.subf %12, %15 : vector<8x128xf32>
    %cst_9 = arith.constant 0.0322580636 : f32
    %17 = vector.broadcast %cst_9 : f32 to vector<8x128xf32>
    %18 = arith.mulf %16, %17 : vector<8x128xf32>
    %cst_10 = arith.constant 0.000000e+00 : f32
    %19 = vector.broadcast %cst_10 : f32 to vector<8x128xf32>
    %20 = arith.maximumf %18, %19 : vector<8x128xf32>
    %21 = math.sqrt %20 : vector<8x128xf32>
    %c0_11 = arith.constant 0 : index
    %c0_12 = arith.constant 0 : index
    %22 = vector.load %arg5[%c0_11, %c0_12] : memref<8x28xf32, #tpu.memory_space<vmem>>, vector<8x28xf32>
    tpu.vector_store %arg5[%c0_11, %c0_12], %6 {strides = array<i32>} : memref<8x28xf32, #tpu.memory_space<vmem>>, vector<8x28xf32>,
    %23 = vector.extract_strided_slice %21 {offsets = [0, 0], sizes = [8, 4], strides = [1, 1]} : vector<8x128xf32> to vector<8x4xf32>
    %c0_13 = arith.constant 0 : index
    %c0_14 = arith.constant 0 : index
    %24 = vector.load %arg6[%c0_13, %c0_14] : memref<8x4xf32, #tpu.memory_space<vmem>>, vector<8x4xf32>
    tpu.vector_store %arg6[%c0_13, %c0_14], %23 {strides = array<i32>} : memref<8x4xf32, #tpu.memory_space<vmem>>, vector<8x4xf32>,
    return
  }
  func.func @transform_0(%arg0: i32) -> (i32, i32) {
    %c0_i32 = arith.constant 0 : i32
    %c0_i32_0 = arith.constant 0 : i32
    return %arg0, %c0_i32 : i32, i32
  }
  func.func @transform_1(%arg0: i32) -> (i32, i32) {
    %c0_i32 = arith.constant 0 : i32
    %c0_i32_0 = arith.constant 0 : i32
    %c0_i32_1 = arith.constant 0 : i32
    return %c0_i32, %c0_i32_0 : i32, i32
  }
  func.func @transform_2(%arg0: i32) -> (i32, i32) {
    %c0_i32 = arith.constant 0 : i32
    %c0_i32_0 = arith.constant 0 : i32
    %c0_i32_1 = arith.constant 0 : i32
    return %c0_i32, %c0_i32_0 : i32, i32
  }
  func.func @transform_3(%arg0: i32) -> (i32, i32) {
    %c0_i32 = arith.constant 0 : i32
    %c0_i32_0 = arith.constant 0 : i32
    %c0_i32_1 = arith.constant 0 : i32
    return %c0_i32, %c0_i32_0 : i32, i32
  }
  func.func @transform_4(%arg0: i32) -> (i32, i32) {
    %c0_i32 = arith.constant 0 : i32
    %c0_i32_0 = arith.constant 0 : i32
    return %arg0, %c0_i32 : i32, i32
  }
  func.func @transform_5(%arg0: i32) -> (i32, i32) {
    %c0_i32 = arith.constant 0 : i32
    %c0_i32_0 = arith.constant 0 : i32
    return %arg0, %c0_i32 : i32, i32
  }
}

</mosaic_0001>

<bundles_post_ra>
// kernel: tpu_custom_call.1
= control target key start
LH: loop header
LB: loop body
LE: loop exit
PB: predicated region body
PF: predicated region fallthrough
CT: control target
= control target key end

     0   :  { %11 = vsyncpa [#allocation3], 0  ;;  %s610_s0 = inlined_call_operand.hbm [shape: f32[8,32], index: 0, kind: input, shape index: {}]   ;;  %s611_s1 = inlined_call_operand.hbm [shape: f32[32,384], index: 1, kind: input, shape index: {}]   ;;  %s612_s2 = inlined_call_operand.hbm [shape: f32[32,128], index: 2, kind: input, shape index: {}]   ;;  %s613_s3 = inlined_call_operand.vmem [shape: f32[1,384], index: 3, kind: input, shape index: {}]   ;;  %s614_s4 = inlined_call_operand.hbm [shape: f32[8,28], index: 4, kind: output, shape index: {0}]   ;;  %s615_s5 = inlined_call_operand.vmem [shape: f32[8,4], index: 5, kind: output, shape index: {1}]  }
   0x1   :  { %12 = vsyncpa [#allocation6], 0 }
   0x2   :  { %13 = vsyncpa [#allocation4], 0  ;;  %s513_s18 = smov [#allocation5]   ;;  %s419_s22 = scalar_lea.hbm %s611_s1, 1536 }
   0x3   :  { %s29_s19 = sshll.u32 %s513_s18, 4  ;;  %p420_p0 = scmp.ne.s32.totalorder %s611_s1, %s419_s22  ;;  %s30_s19 = int_to_ptr.vmem [resolvable:$true] %s29_s19 }
   0x4   :  { %p423_p1 = scmp.lt.u32.totalorder %s419_s22, %s611_s1 }
   0x6   :  { %p425_p2 = pnand %p423_p1, %p420_p0 }
   0x8   :  { %428 = shalt.err (!%p425_p2)
}
   0x9   :  { %s429_s27 = scalar_lea.vmem %s30_s19, 1536  ;;  %p434_p4 = scmp.lt.s32.totalorder %s30_s19, %s30_s19 }
   0xa   :  { %p430_p3 = scmp.ne.s32.totalorder %s30_s19, %s429_s27  ;;  %p435_p5 = scmp.lt.s32.totalorder %s429_s27, %s429_s27 }
   0xc   :  { %p436_p6 = por %p435_p5, %p434_p4 }
   0xe   :  { %p437_p7 = pnand %p436_p6, %p430_p3 }
  0x10   :  { %440 = shalt.err (!%p437_p7)
}
  0x11   :  { %s514_s28 = smov 384   ;;  %s515_s29 = smov 24  }
  0x12   :  { %35 = dma.hbm_to_vmem [thread:$0]  %s611_s1, 1536, %s30_s19, [#allocation6], %s514_s28, %s514_s28, %s515_s29  }
  0x13   :  { %s516_s7 = smov [#allocation2]   ;;  %s517_s9 = smov [#allocation7]  }
  0x14   :  { %s20_s8 = sshll.u32 %s516_s7, 4  ;;  %s41_s10 = sshll.u32 %s517_s9, 4  ;;  %s21_s8 = int_to_ptr.vmem [resolvable:$true] %s20_s8  ;;  %s42_s10 = int_to_ptr.vmem [resolvable:$true] %s41_s10 }
  0x15   :  { %s441_s13 = scalar_lea.hbm %s610_s0, 128 }
  0x16   :  { %p442_p8 = scmp.ne.s32.totalorder %s610_s0, %s441_s13  ;;  %p445_p9 = scmp.lt.u32.totalorder %s441_s13, %s610_s0 }
  0x18   :  { %p447_p10 = pnand %p445_p9, %p442_p8 }
  0x1a   :  { %450 = shalt.err (!%p447_p10)
}
  0x1b   :  { %s451_s1 = scalar_lea.vmem %s21_s8, 128  ;;  %p456_p12 = scmp.lt.s32.totalorder %s21_s8, %s21_s8 }
  0x1c   :  { %p452_p11 = scmp.ne.s32.totalorder %s21_s8, %s451_s1  ;;  %p457_p13 = scmp.lt.s32.totalorder %s451_s1, %s451_s1 }
  0x1e   :  { %p458_p0 = por %p457_p13, %p456_p12 }
  0x20   :  { %p459_p1 = pnand %p458_p0, %p452_p11 }
  0x22   :  { %462 = shalt.err (!%p459_p1)
}
  0x23   :  { %23 = dma.hbm_to_vmem [thread:$0]  %s610_s0, 128, %s21_s8, [#allocation3]  }
  0x24   :  { %s463_s22 = scalar_lea.hbm %s612_s2, 512 }
  0x25   :  { %p464_p2 = scmp.ne.s32.totalorder %s612_s2, %s463_s22  ;;  %p467_p3 = scmp.lt.u32.totalorder %s463_s22, %s612_s2 }
  0x27   :  { %p469_p4 = pnand %p467_p3, %p464_p2 }
  0x29   :  { %472 = shalt.err (!%p469_p4)
}
  0x2a   :  { %s473_s27 = scalar_lea.vmem %s42_s10, 512  ;;  %p478_p6 = scmp.lt.s32.totalorder %s42_s10, %s42_s10 }
  0x2b   :  { %p474_p5 = scmp.ne.s32.totalorder %s42_s10, %s473_s27  ;;  %p479_p7 = scmp.lt.s32.totalorder %s473_s27, %s473_s27 }
  0x2d   :  { %p480_p8 = por %p479_p7, %p478_p6 }
  0x2f   :  { %p481_p9 = pnand %p480_p8, %p474_p5 }
  0x31   :  { %484 = shalt.err (!%p481_p9)
}
  0x32   :  { %s518_s0 = smov 128   ;;  %s519_s28 = smov 8  }
  0x33   :  { %47 = dma.hbm_to_vmem [thread:$0]  %s612_s2, 512, %s42_s10, [#allocation6], %s518_s0, %s518_s0, %s519_s28  }
  0x34   :  { %507 = dma.done.wait [#allocation3], 128  }
  0x35   :  { %508 = vsyncadd [#allocation3], 4294967168 }
  0x36   :  { %509 = dma.done.wait [#allocation6], 2048  }
  0x37   :  { %510 = vsyncadd [#allocation6], 4294965248  ;;  %v520_v0 = vmov 0.0|0.0   ;;  %vm521_vm0 = vmmov 0   ;;  %v522_v1 = vmov 0.0   ;;  %v62_v2 = vld [vmem:[#allocation5 + $0x10] sm:$0xff]  ;;  %v74_v28 = vlaneseq }
  0x38   :  { %391 = vmatprep.subr.bf16.mxu1 %v520_v0  ;;  %369 = vmatprep.mubr.msk.f32.mxu1 %vm521_vm0, %v522_v1  ;;  %v65_v3 = vld [vmem:[#allocation5 + $0x28] sm:$0xff]  ;;  %v64_v6 = vld [vmem:[#allocation5 + $0x20] sm:$0xff]  ;;  %v63_v8 = vld [vmem:[#allocation5 + $0x18] sm:$0xff]  ;;  %vm89_vm1 = vcmask 261120   ;;  %s523_s7 = smov [#allocation8]   ;;  %vm324_vm2 = vcmask 228352  }
  0x39   :  { %157 = vmatprep.mubr.f32.mxu0 %v522_v1  ;;  %v61_v4 = vld [vmem:[#allocation5 + $0x8] sm:$0xff]  ;;  %v392_v5 = vpack.c.bf16 %v65_v3, %v62_v2  ;;  %v60_v7 = vld [vmem:[#allocation5] sm:$0xff]  ;;  %v71_v12 = vld [vmem:[#allocation5 + $0x58] sm:$0xff]  ;;  %v75_v29 = vshrl.u32 %v74_v28, 7  ;;  %s334_s8 = sshll.u32 %s523_s7, 4  ;;  %s335_s8 = int_to_ptr.vmem [resolvable:$true] %s334_s8 }
  0x3a   :  { %v383_v9 = vpack.c.bf16 %v64_v6, %v61_v4  ;;  %v385_v10 = vpack.c.bf16 %v63_v8, %v60_v7  ;;  %v68_v11 = vld [vmem:[#allocation5 + $0x40] sm:$0xff]  ;;  %v67_v13 = vld [vmem:[#allocation5 + $0x38] sm:$0xff]  ;;  %v70_v15 = vld [vmem:[#allocation5 + $0x50] sm:$0xff]  ;;  %s485_s9 = scalar_lea.vmem %s335_s8, 128  ;;  %p490_p11 = scmp.lt.s32.totalorder %s335_s8, %s335_s8 }
  0x3b   :  { %393 = vmatpush3.bf16.msra.mxu1 %v392_v5  ;;  %v395_v14 = vpack.c.bf16 %v71_v12, %v68_v11  ;;  %v66_v16 = vld [vmem:[#allocation5 + $0x30] sm:$0xff]  ;;  %v69_v17 = vld [vmem:[#allocation5 + $0x48] sm:$0xff]  ;;  %v387_v18 = vpack.c.bf16 %v70_v15, %v67_v13  ;;  %v235_v19 = vld [vmem:[#allocation7] sm:$0xff]  ;;  %v76_v30 = vsub.s32 0, %v75_v29  ;;  %v80_v32 = vsub.s32 1, %v75_v29  ;;  %p486_p10 = scmp.ne.s32.totalorder %s335_s8, %s485_s9  ;;  %p491_p12 = scmp.lt.s32.totalorder %s485_s9, %s485_s9 }
  0x3c   :  { %384 = vmatprep.subr.bf16.mxu0 %v383_v9  ;;  %394 = vmatprep.subr.bf16.mxu1 %v520_v0  ;;  %v236_v20 = vld [vmem:[#allocation7 + $0x8] sm:$0xff]  ;;  %v389_v21 = vpack.c.bf16 %v69_v17, %v66_v16  ;;  %v59_v22 = vld [vmem:[#allocation2] sm:$0xff]  ;;  %v237_v24 = vld [vmem:[#allocation7 + $0x10] sm:$0xff]  ;;  %v84_v35 = vsub.s32 2, %v75_v29 }
  0x3d   :  { %386 = vmatpush1.bf16.msra.mxu0 %v385_v10  ;;  %v398_v23 = vpack.c.bf16 %v236_v20, %v235_v19  ;;  %v238_v25 = vld [vmem:[#allocation7 + $0x18] sm:$0xff]  ;;  %v234_v27 = vmul.f32 %v59_v22, %v59_v22  ;;  %p492_p13 = por %p491_p12, %p490_p11 }
  0x3e   :  { %388 = vmatprep.subr.bf16.mxu0 %v387_v18  ;;  %v401_v26 = vpack.c.bf16 %v238_v25, %v237_v24  ;;  %v72_v31 = vld [vmem:[%s613_s3] sm:$0x7] }
  0x3f   :  { %396 = vmatpush3.bf16.msra.mxu1 %v395_v14  ;;  %v77_v33 = vrot.slane %v72_v31, %v76_v30  ;;  %v81_v34 = vrot.slane %v72_v31, %v80_v32  ;;  %v85_v40 = vrot.slane %v72_v31, %v84_v35  ;;  %p493_p0 = pnand %p492_p13, %p486_p10 }
  0x40   :  { %397 = vmatprep.subr.bf16.mxu1 %v520_v0 }
  0x41   :  { %390 = vmatpush1.bf16.msra.mxu0 %v389_v21 }
  0x42   :  { %370 = vmatmul.mubr.msk.f32.vlgmr.msra.gmra.mrb[0].mxu1 %vm89_vm1, %v59_v22 }
  0x43   :  { %399 = vmatpush3.bf16.msra.mxu1 %v398_v23  ;;  %380 = vmatprep.mubr.msk.f32.mxu1 %vm521_vm0, %v522_v1 }
  0x44   :  { %348 = vmatmul.mubr.msk.f32.vlgmr.msra.gmra.mrb[0].mxu0 %vm89_vm1, %v59_v22  ;;  %400 = vmatprep.subr.bf16.mxu1 %v520_v0 }
  0x47   :  { %402 = vmatpush3.bf16.msra.mxu1 %v401_v26 }
  0x4a   :  { %381 = vmatmul.mubr.msk.f32.vlgmr.msra.gmra.mrb[0].mxu1 %vm89_vm1, %v234_v27 }
 0x117   :  { %v159_v36 = vpop.f32.mrb[0].mxu0 }
 0x118   :  { %v160_v37 = vadd.f32 %v159_v36, %v77_v33  ;;  %v161_v38 = vpop.f32.mrb[1].mxu0 }
 0x119   :  { %v162_v39 = vadd.f32 %v161_v38, %v81_v34 }
 0x11a   :  { %325 = vst.msk [vmem:[#allocation8] sm:$0xff] %vm324_vm2, %v160_v37 }
 0x11b   :  { %v312_v41 = vmul.f32 %v162_v39, %v162_v39 }
 0x11c   :  { %496 = shalt.err (!%p493_p0)
}
 0x11d   :  { %s497_s11 = scalar_lea.hbm %s614_s4, 128 }
 0x11e   :  { %p498_p1 = scmp.ne.s32.totalorder %s614_s4, %s497_s11  ;;  %p501_p2 = scmp.lt.u32.totalorder %s497_s11, %s614_s4 }
 0x120   :  { %p503_p3 = pnand %p501_p2, %p498_p1 }
 0x122   :  { %506 = shalt.err (!%p503_p3)
}
 0x123   :  { %337 = dma.vmem_to_hbm [thread:$0]  %s335_s8, 128, %s614_s4, [#allocation4]   ;;  %v313_v42 = vmul.f32 0.03125, %v312_v41  ;;  %v308_v43 = vpop.f32.mrb[0].mxu1  ;;  %vm326_vm4 = vcmask 31744  }
 0x124   :  { %v403_v44 = vadd.f32 %v308_v43, %v85_v40  ;;  %v382_v45 = vpop.f32.mrb[1].mxu1 }
 0x126   :  { %v314_v46 = vsub.f32 %v403_v44, %v313_v42 }
 0x128   :  { %v315_v47 = vmul.f32 0.032258064, %v314_v46 }
 0x12a   :  { %v316_v48 = vmax.f32 %v315_v47, 0.0 }
 0x12c   :  { %417 = vrsqrt.f32 %v316_v48  ;;  %vm319_vm3 = vcmp.eq.f32.partialorder %v316_v48, inf  ;;  %v322_v51 = vand.u32 2147483648, %v316_v48  ;;  %vm321_vm5 = vcmp.eq.f32.partialorder %v316_v48, 0.0 }
 0x136   :  { %v418_v49 = vpop.eup %417 }
 0x137   :  { %v318_v50 = vmul.f32 %v418_v49, %v316_v48 }
 0x139   :  { %v320_v52 = vsel %vm319_vm3, %v316_v48, %v318_v50 }
 0x13a   :  { %v323_v53 = vsel %vm321_vm5, %v322_v51, %v320_v52 }
 0x13b   :  { %327 = vst.msk [vmem:[%s615_s5] sm:$0xff] %vm326_vm4, %v323_v53 }
 0x13c   :  { %511 = dma.done.wait [#allocation4], 128  }
 0x13d   :  { %512 = vsyncadd [#allocation4], 4294967168 }
 0x13e   :  { %345 = vsyncpa [#allocation3], 1 }
 0x13f   :  { %346 = vsyncpa [#allocation6], 1 }
 0x140   :  { %347 = vsyncpa [#allocation4], 1 }

</bundles_post_ra>
